<compile_context>
chip_gen: v6e
topology: v6e:2x2x1
jax: 0.10.0
libtpu: 0.0.40
codegen_flags: <defaults>
</compile_context>

<pallas_src>
import jax
import jax.numpy as jnp
from jax.experimental import pallas as pl
from jax.experimental.pallas import tpu as pltpu

_ROW_ALIGN = 32                 # block second-minor multiple, safe for 32/16/8-bit dtypes
_PALLAS_MIN_ELEMENTS = 1 << 16  # below this, the XLA fusion is cheaper than a launch


def _round_up(x: int, m: int) -> int:
    return ((x + m - 1) // m) * m


def _vmem_capacity_bytes() -> int:
    """Physical VMEM of the current generation; conservative fallback."""
    try:
        info = pltpu.get_tpu_info()
        cap = getattr(info, "vmem_capacity_bytes", None)
        if cap:
            return int(cap)
    except Exception:
        pass
    return 64 << 20  # v7x per-TensorCore VMEM (smallest of v5e/v6e/v7x)


def _pick_cols(n: int):
    """Widest lane-dense column count that divides n exactly (no padding)."""
    for cols in (1024, 512, 256, 128):
        if n % cols == 0:
            return cols
    return None


def _pick_tiling(rows: int, cols: int, itemsize: int):
    """Returns (block_rows, vmem_limit_bytes) for a (rows, cols) slab."""
    vmem_phys = _vmem_capacity_bytes()
    # Budget: 3 arrays (pos, neg, out) x 2 pipeline buffers per tile.
    budget = min(vmem_phys // 4, 32 << 20)
    row_bytes = cols * itemsize
    max_rows_vmem = max(_ROW_ALIGN,
                        (budget // (6 * row_bytes)) // _ROW_ALIGN * _ROW_ALIGN)
    # Keep at least 2 grid steps so v7x can shard work over both TensorCores.
    half_rows = max(_ROW_ALIGN, _round_up((rows + 1) // 2, _ROW_ALIGN))
    block_rows = min(max_rows_vmem, half_rows)
    if block_rows >= rows:
        block_rows = rows  # single full-extent block (always legal)
    vmem_limit = int(min(vmem_phys // 2, 64 << 20))
    return block_rows, vmem_limit


def _ltn_dist_kernel(pos_ref, neg_ref, out_ref):
    # Elementwise hot path on a lane-dense (block_rows, cols) tile.
    # Load at HBM dtype, compute in f32 (safe on v5e, free on v6e/v7x),
    # store at the output dtype.  Strictly HBM-bandwidth-bound; the
    # subtract (VPU) and sigmoid (EUP) hide under the DMA.
    diff = pos_ref[...].astype(jnp.float32) - neg_ref[...].astype(jnp.float32)
    out_ref[...] = jax.nn.sigmoid(diff).astype(out_ref.dtype)


def _ltn_dist_pallas(pos2d: jax.Array, neg2d: jax.Array, out_dtype) -> jax.Array:
    rows, cols = pos2d.shape
    n = rows * cols
    in_bytes = pos2d.dtype.itemsize + neg2d.dtype.itemsize
    out_itemsize = jnp.dtype(out_dtype).itemsize
    itemsize = max(pos2d.dtype.itemsize, neg2d.dtype.itemsize, out_itemsize)

    block_rows, vmem_limit = _pick_tiling(rows, cols, itemsize)
    grid = (pl.cdiv(rows, block_rows),)
    block = pl.BlockSpec((block_rows, cols), lambda i: (i, 0))

    cost = pl.CostEstimate(
        flops=2 * n,                       # subtract + final scale inside sigmoid
        transcendentals=n,                 # one exp per element
        bytes_accessed=n * in_bytes + n * out_itemsize,
    )

    return pl.pallas_call(
        _ltn_dist_kernel,
        out_shape=jax.ShapeDtypeStruct((rows, cols), out_dtype),
        grid=grid,
        in_specs=[block, block],
        out_specs=block,
        compiler_params=pltpu.CompilerParams(
            dimension_semantics=("parallel",),
            vmem_limit_bytes=vmem_limit,
        ),
        cost_estimate=cost,
    )(pos2d, neg2d)


def ltn_loss(pos_scores: jax.Array, neg_scores: jax.Array,
             *, force_pallas: bool = False) -> jax.Array:
    """BPR / LTN Dist predicate: sigmoid(pos_scores - neg_scores), elementwise."""
    assert pos_scores.shape == neg_scores.shape

    res_dtype = jnp.result_type(pos_scores.dtype, neg_scores.dtype)
    out_dtype = res_dtype if jnp.issubdtype(res_dtype, jnp.floating) else jnp.float32

    n = pos_scores.size
    if n == 0:
        return jnp.zeros(pos_scores.shape, out_dtype)

    cols = _pick_cols(n)
    use_pallas = (force_pallas or n >= _PALLAS_MIN_ELEMENTS) and cols is not None

    if not use_pallas:
        # XLA's fusion of this elementwise op is already at the 3N-byte HBM
        # roofline; padding ragged sizes for Pallas would only add HBM passes.
        diff = pos_scores.astype(jnp.float32) - neg_scores.astype(jnp.float32)
        return jax.nn.sigmoid(diff).astype(out_dtype)

    rows = n // cols
    out2d = _ltn_dist_pallas(pos_scores.reshape(rows, cols),
                             neg_scores.reshape(rows, cols),
                             out_dtype)
    return out2d.reshape(pos_scores.shape)


if __name__ == "__main__":
    key = jax.random.PRNGKey(0)
    k_pos, k_neg = jax.random.split(key)

    # Small batch of BPR scores (outputs of the Score function).
    batch = 256
    pos = jax.random.normal(k_pos, (batch,), dtype=jnp.float32)
    neg = jax.random.normal(k_neg, (batch,), dtype=jnp.float32)

    # Force the Pallas path so the kernel actually runs at this small size.
    out = jax.block_until_ready(ltn_loss(pos, neg, force_pallas=True))
    ref = jax.nn.sigmoid(pos - neg)
    assert out.shape == ref.shape and out.dtype == pos.dtype
    assert jnp.allclose(out, ref, atol=1e-6, rtol=1e-6)

    # Larger batch: takes the Pallas path automatically, with a multi-step
    # grid and a ragged (masked) final block — no padding, no output slice.
    batch2 = 125 * 1024
    pos2 = jax.random.normal(k_pos, (batch2,), dtype=jnp.float32)
    neg2 = jax.random.normal(k_neg, (batch2,), dtype=jnp.float32)
    out2 = jax.block_until_ready(ltn_loss(pos2, neg2))
    ref2 = jax.nn.sigmoid(pos2 - neg2)
    assert jnp.allclose(out2, ref2, atol=1e-6, rtol=1e-6)

    # Small-batch / ragged fallback path (plain XLA fusion).
    out3 = jax.block_until_ready(ltn_loss(pos, neg))
    assert jnp.allclose(out3, ref, atol=1e-6, rtol=1e-6)

    print("KERNEL_OK")
</pallas_src>

<mosaic_0001>
module attributes {stable_mosaic.version = 11 : i64} {
  func.func @_ltn_dist_kernel(%arg0: i32, %arg1: memref<1x256xf32, #tpu.memory_space<vmem>>, %arg2: memref<1x256xf32, #tpu.memory_space<vmem>>, %arg3: memref<1x256xf32, #tpu.memory_space<vmem>>) attributes {dimension_semantics = [#tpu.dimension_semantics<parallel>], iteration_bounds = array<i64: 1>, scalar_prefetch = 0 : i64, scratch_operands = 0 : i64, tpu.core_type = #tpu.core_type<tc>, window_params = [{transform_indices = @transform_0, window_bounds = array<i64: 1, 256>}, {transform_indices = @transform_1, window_bounds = array<i64: 1, 256>}, {transform_indices = @transform_2, window_bounds = array<i64: 1, 256>}]} {
    %c0 = arith.constant 0 : index
    %c0_0 = arith.constant 0 : index
    %0 = vector.load %arg1[%c0, %c0_0] : memref<1x256xf32, #tpu.memory_space<vmem>>, vector<1x256xf32>
    %c0_1 = arith.constant 0 : index
    %c0_2 = arith.constant 0 : index
    %1 = vector.load %arg2[%c0_1, %c0_2] : memref<1x256xf32, #tpu.memory_space<vmem>>, vector<1x256xf32>
    %2 = arith.subf %0, %1 : vector<1x256xf32>
    %3 = arith.negf %2 : vector<1x256xf32>
    %4 = math.exp %3 : vector<1x256xf32>
    %cst = arith.constant 1.000000e+00 : f32
    %5 = vector.broadcast %cst : f32 to vector<1x256xf32>
    %6 = arith.addf %5, %4 : vector<1x256xf32>
    %7 = arith.divf %5, %6 : vector<1x256xf32>
    %c0_3 = arith.constant 0 : index
    %c0_4 = arith.constant 0 : index
    %8 = vector.load %arg3[%c0_3, %c0_4] : memref<1x256xf32, #tpu.memory_space<vmem>>, vector<1x256xf32>
    tpu.vector_store %arg3[%c0_3, %c0_4], %7 {strides = array<i32>} : memref<1x256xf32, #tpu.memory_space<vmem>>, vector<1x256xf32>,
    return
  }
  func.func @transform_0(%arg0: i32) -> (i32, i32) {
    %c0_i32 = arith.constant 0 : i32
    %c0_i32_0 = arith.constant 0 : i32
    return %arg0, %c0_i32 : i32, i32
  }
  func.func @transform_1(%arg0: i32) -> (i32, i32) {
    %c0_i32 = arith.constant 0 : i32
    %c0_i32_0 = arith.constant 0 : i32
    return %arg0, %c0_i32 : i32, i32
  }
  func.func @transform_2(%arg0: i32) -> (i32, i32) {
    %c0_i32 = arith.constant 0 : i32
    %c0_i32_0 = arith.constant 0 : i32
    return %arg0, %c0_i32 : i32, i32
  }
}

</mosaic_0001>

<bundles_post_ra>
// kernel: tpu_custom_call.1
= control target key start
LH: loop header
LB: loop body
LE: loop exit
PB: predicated region body
PF: predicated region fallthrough
CT: control target
= control target key end

     0   :  { %7 = vsyncpa [#allocation3], 0  ;;  %s167_s0 = inlined_call_operand.hbm [shape: f32[1,256], index: 0, kind: input, shape index: {}]   ;;  %s168_s1 = inlined_call_operand.hbm [shape: f32[1,256], index: 1, kind: input, shape index: {}]   ;;  %s169_s2 = inlined_call_operand.hbm [shape: f32[1,256], index: 2, kind: output, shape index: {}]  }
   0x1   :  { %8 = vsyncpa [#allocation6], 0 }
   0x2   :  { %9 = vsyncpa [#allocation4], 0  ;;  %s140_s9 = smov [#allocation2]   ;;  %s141_s11 = smov [#allocation5]  }
   0x3   :  { %s16_s10 = sshll.u32 %s140_s9, 4  ;;  %s26_s12 = sshll.u32 %s141_s11, 4  ;;  %s17_s10 = int_to_ptr.vmem [resolvable:$true] %s16_s10  ;;  %s27_s12 = int_to_ptr.vmem [resolvable:$true] %s26_s12 }
   0x4   :  { %s82_s13 = scalar_lea.vmem %s17_s10, 32  ;;  %p87_p1 = scmp.lt.s32.totalorder %s17_s10, %s17_s10 }
   0x5   :  { %p83_p0 = scmp.ne.s32.totalorder %s17_s10, %s82_s13  ;;  %p88_p2 = scmp.lt.s32.totalorder %s82_s13, %s82_s13 }
   0x7   :  { %p89_p3 = por %p88_p2, %p87_p1 }
   0x9   :  { %p90_p4 = pnand %p89_p3, %p83_p0 }
   0xb   :  { %93 = shalt.err (!%p90_p4)
}
   0xc   :  { %19 = dma.hbm_to_vmem [thread:$0]  %s167_s0, 32, %s17_s10, [#allocation3]  }
   0xd   :  { %s102_s16 = scalar_lea.vmem %s27_s12, 32  ;;  %p107_p6 = scmp.lt.s32.totalorder %s27_s12, %s27_s12 }
   0xe   :  { %p103_p5 = scmp.ne.s32.totalorder %s27_s12, %s102_s16  ;;  %p108_p7 = scmp.lt.s32.totalorder %s102_s16, %s102_s16 }
  0x10   :  { %p109_p8 = por %p108_p7, %p107_p6 }
  0x12   :  { %p110_p9 = pnand %p109_p8, %p103_p5 }
  0x14   :  { %113 = shalt.err (!%p110_p9)
}
  0x15   :  { %29 = dma.hbm_to_vmem [thread:$0]  %s168_s1, 32, %s27_s12, [#allocation6]  }
  0x16   :  { %134 = dma.done.wait [#allocation3], 32  }
  0x17   :  { %135 = vsyncadd [#allocation3], 4294967264 }
  0x18   :  { %136 = dma.done.wait [#allocation6], 32  }
  0x19   :  { %137 = vsyncadd [#allocation6], 4294967264  ;;  %v36_v0 = vld [vmem:[#allocation2] sm:$0x3]  ;;  %v37_v1 = vld [vmem:[#allocation5] sm:$0x3]  ;;  %v45_v6 = vlaneseq }
  0x1a   :  { %v38_v2 = vsub.f32 %v36_v0, %v37_v1  ;;  %s142_s0 = smov [#allocation7]  }
  0x1b   :  { %s56_s19 = sshll.u32 %s142_s0, 4  ;;  %vm47_vm0 = vcmp.lt.s32.totalorder %v45_v6, 256  ;;  %s57_s19 = int_to_ptr.vmem [resolvable:$true] %s56_s19 }
  0x1c   :  { %v66_v3 = vmul.f32 -1.442695, %v38_v2  ;;  %s114_s1 = scalar_lea.vmem %s57_s19, 32  ;;  %p119_p11 = scmp.lt.s32.totalorder %s57_s19, %s57_s19 }
  0x1d   :  { %p115_p10 = scmp.ne.s32.totalorder %s57_s19, %s114_s1  ;;  %p120_p12 = scmp.lt.s32.totalorder %s114_s1, %s114_s1 }
  0x1e   :  { %70 = vpow2.f32 %v66_v3 }
  0x1f   :  { %p121_p13 = por %p120_p12, %p119_p11 }
  0x21   :  { %p122_p0 = pnand %p121_p13, %p115_p10 }
  0x2b   :  { %v71_v4 = vpop.eup %70 }
  0x2c   :  { %v42_v5 = vadd.f32 1.0, %v71_v4 }
  0x2e   :  { %72 = vrcp.f32 %v42_v5 }
  0x3b   :  { %v73_v7 = vpop.eup %72 }
  0x3c   :  { %49 = vst.msk [vmem:[#allocation7] sm:$0x3] %vm47_vm0, %v73_v7 }
  0x3d   :  { %125 = shalt.err (!%p122_p0)
}
  0x3e   :  { %59 = dma.vmem_to_hbm [thread:$0]  %s57_s19, 32, %s169_s2, [#allocation4]  }
  0x3f   :  { %138 = dma.done.wait [#allocation4], 32  }
  0x40   :  { %139 = vsyncadd [#allocation4], 4294967264 }
  0x41   :  { %63 = vsyncpa [#allocation3], 1 }
  0x42   :  { %64 = vsyncpa [#allocation6], 1 }
  0x43   :  { %65 = vsyncpa [#allocation4], 1 }

</bundles_post_ra>
